<compile_context>
chip_gen: v5e
topology: v5e:2x2
jax: 0.10.0
libtpu: 0.0.40
codegen_flags: <defaults>
</compile_context>

<pallas_src>
import functools

import jax
import jax.numpy as jnp
from jax.experimental import pallas as pl
from jax.experimental.pallas import tpu as pltpu

_LANE = 128
_SUBLANE = 8
_EPS = 1e-5


def _round_up(x, m):
    return ((x + m - 1) // m) * m


# --------------------------------------------------------------------------
# Kernel: whole MLP stack fused (statically unrolled over layers).
# --------------------------------------------------------------------------
def _fused_mlp_kernel(x_ref, w_ref, v_ref, o_ref, *, n_layers, k_pad):
    """x_ref: [B, k_pad]        padded input activations (f32)
    w_ref: [L, k_pad, F_pad]    pre-transposed, zero-padded weights (bf16, x @ W)
    v_ref: [L, 8, F_pad]        rows 0/1/2 = bias / gamma / beta (f32, rest 0)
    o_ref: [B, F_pad]           lane-dense padded output (f32)
    """
    h = x_ref[...]                                   # f32
    inv_n = 1.0 / h.shape[0]                         # true semantic batch size

    for i in range(n_layers):                        # statically unrolled
        w = w_ref[i]                                 # [k_pad, F_pad] bf16
        vec = v_ref[i]                               # [8, F_pad] f32
        b, gamma, beta = vec[0:1, :], vec[1:2, :], vec[2:3, :]

        # Linear on the MXU: bf16 operands, f32 accumulation. Only the first
        # k_pad feature lanes can be non-zero, so slice them (contiguous, static).
        lhs = h[:, :k_pad].astype(jnp.bfloat16)
        z = jnp.dot(lhs, w, preferred_element_type=jnp.float32) + b

        # BatchNorm1d over the batch axis (biased variance, eps=1e-5), with the
        # affine folded into one scale/shift.  All math in f32.
        mean = jnp.sum(z, axis=0, keepdims=True) * inv_n
        mean_sq = jnp.sum(z * z, axis=0, keepdims=True) * inv_n
        var = jnp.maximum(mean_sq - mean * mean, 0.0)
        scale = gamma * jax.lax.rsqrt(var + _EPS)    # [1, F_pad]
        shift = beta - mean * scale                  # [1, F_pad]
        y = z * scale + shift

        # ReLU on hidden layers, Sigmoid on the final layer.
        h = jnp.maximum(y, 0.0) if i < n_layers - 1 else jax.nn.sigmoid(y)

    o_ref[...] = h.astype(o_ref.dtype)


# --------------------------------------------------------------------------
# Host-side packing (done ONCE) and jitted forward closure.
# --------------------------------------------------------------------------
def make_forward_fn(params, input_size, output_size):
    """Pack per-layer (W[F_out,F_in], b, gamma, beta) into lane-dense slabs once
    and return a jitted forward(x) closure that reuses them on every call."""
    n_layers = len(params)
    f_ins = [input_size] + [w.shape[0] for (w, _, _, _) in params[:-1]]
    max_f_out = max(w.shape[0] for (w, _, _, _) in params)

    k_pad = _round_up(max(f_ins), _SUBLANE)               # reduction axis (32 here)
    f_pad = _round_up(max(max_f_out, _LANE), _LANE)       # lane-dense feature axis
    assert k_pad <= f_pad, "hidden activations must cover the widest f_in"

    # Pack once (init-time cost only): bf16 weights, f32 bias/gamma/beta.
    w_slab = jnp.zeros((n_layers, k_pad, f_pad), jnp.bfloat16)
    v_slab = jnp.zeros((n_layers, 8, f_pad), jnp.float32)
    for i, (w, b, gamma, beta) in enumerate(params):
        f_out, f_in = w.shape
        w_slab = w_slab.at[i, :f_in, :f_out].set(w.T.astype(jnp.bfloat16))
        v_slab = v_slab.at[i, 0, :f_out].set(b)
        v_slab = v_slab.at[i, 1, :f_out].set(gamma)
        v_slab = v_slab.at[i, 2, :f_out].set(beta)

    kernel = functools.partial(_fused_mlp_kernel, n_layers=n_layers, k_pad=k_pad)

    @jax.jit
    def forward(x):
        b_sz = x.shape[0]
        x_pad = jnp.pad(x.astype(jnp.float32),
                        ((0, 0), (0, k_pad - input_size)))
        out_pad = pl.pallas_call(
            kernel,
            out_shape=jax.ShapeDtypeStruct((b_sz, f_pad), jnp.float32),
            in_specs=[
                pl.BlockSpec(memory_space=pltpu.MemorySpace.VMEM),  # x_pad
                pl.BlockSpec(memory_space=pltpu.MemorySpace.VMEM),  # weight slab
                pl.BlockSpec(memory_space=pltpu.MemorySpace.VMEM),  # b/gamma/beta slab
            ],
            out_specs=pl.BlockSpec(memory_space=pltpu.MemorySpace.VMEM),
            compiler_params=pltpu.CompilerParams(
                # sized against v7x's 64 MiB physical VMEM; current residency
                # is only a few hundred KiB.
                vmem_limit_bytes=32 * 1024 * 1024,
            ),
        )(x_pad, w_slab, v_slab)
        # TODO(synk): for very large batches (B >~ 10-15K rows on v7x), switch
        # to a batch-chunk grid marked "parallel" with a two-pass BN reduction
        # (accumulate sum/sum-sq across chunks in VMEM scratch using the TRUE
        # semantic batch count, then normalize in a second pass).
        return out_pad[:, :output_size]

    return forward


# --------------------------------------------------------------------------
# Parameter init (PyTorch-style) and pure-JAX references.
# --------------------------------------------------------------------------
def init_params(key, input_size, hidden_sizes, output_size):
    sizes = (input_size, *hidden_sizes, output_size)
    params = []
    for i in range(1, len(sizes)):
        f_in, f_out = sizes[i - 1], sizes[i]
        key, kw, kb = jax.random.split(key, 3)
        bound = 1.0 / jnp.sqrt(jnp.float32(f_in))
        w = jax.random.uniform(kw, (f_out, f_in), jnp.float32, -bound, bound)
        b = jax.random.uniform(kb, (f_out,), jnp.float32, -bound, bound)
        params.append((w, b, jnp.ones((f_out,), jnp.float32),
                       jnp.zeros((f_out,), jnp.float32)))
    return params


def _reference_forward_f32(x, params):
    """Pure f32 reference matching the PyTorch module semantics."""
    h = x
    for i, (w, b, gamma, beta) in enumerate(params):
        z = h @ w.T + b
        mean = jnp.mean(z, axis=0, keepdims=True)
        var = jnp.mean((z - mean) ** 2, axis=0, keepdims=True)
        y = (z - mean) * jax.lax.rsqrt(var + _EPS) * gamma + beta
        h = jnp.maximum(y, 0.0) if i < len(params) - 1 else jax.nn.sigmoid(y)
    return h


def _reference_forward_bf16_matmul(x, params):
    """Reference mirroring the kernel's numerics (bf16 dot operands with f32
    accumulation, folded BN scale/shift) for a tight correctness check."""
    h = x
    for i, (w, b, gamma, beta) in enumerate(params):
        z = jnp.dot(h.astype(jnp.bfloat16), w.T.astype(jnp.bfloat16),
                    preferred_element_type=jnp.float32) + b
        mean = jnp.mean(z, axis=0, keepdims=True)
        mean_sq = jnp.mean(z * z, axis=0, keepdims=True)
        var = jnp.maximum(mean_sq - mean * mean, 0.0)
        scale = gamma * jax.lax.rsqrt(var + _EPS)
        shift = beta - mean * scale
        y = z * scale + shift
        h = jnp.maximum(y, 0.0) if i < len(params) - 1 else jax.nn.sigmoid(y)
    return h


if __name__ == "__main__":
    # votePrediction-style problem: small binary-vote inputs, single output.
    batch = 8
    input_size = 8
    hidden_sizes = [32, 16]
    output_size = 1

    key = jax.random.PRNGKey(0)
    key, kx = jax.random.split(key)
    x = jax.random.bernoulli(kx, 0.5, (batch, input_size)).astype(jnp.float32)

    params = init_params(key, input_size, hidden_sizes, output_size)

    # Slabs are packed once here; each forward() call reuses them.
    forward = make_forward_fn(params, input_size, output_size)

    out = jax.block_until_ready(forward(x))
    assert out.shape == (batch, output_size)
    assert jnp.all(jnp.isfinite(out))

    # Tight check vs a reference that models the kernel's bf16-matmul numerics.
    ref_tight = _reference_forward_bf16_matmul(x, params)
    assert jnp.allclose(out, ref_tight, atol=2e-3, rtol=2e-3), \
        "mismatch vs bf16-matmul reference"

    # Looser sanity check vs the pure-f32 module semantics (bf16 dot operands).
    ref_f32 = _reference_forward_f32(x, params)
    assert jnp.allclose(out, ref_f32, atol=5e-2, rtol=5e-2), \
        "mismatch vs f32 reference"

    # Second call: packed slabs / compiled executable are reused (no repacking).
    out2 = jax.block_until_ready(forward(x))
    assert jnp.allclose(out, out2)

    print("KERNEL_OK")
</pallas_src>

<mosaic_0001>
module attributes {stable_mosaic.version = 11 : i64} {
  func.func @_fused_mlp_kernel(%arg0: memref<8x32xf32, #tpu.memory_space<vmem>>, %arg1: memref<3x32x128xbf16, #tpu.memory_space<vmem>>, %arg2: memref<3x8x128xf32, #tpu.memory_space<vmem>>, %arg3: memref<8x128xf32, #tpu.memory_space<vmem>>) attributes {dimension_semantics = [], scalar_prefetch = 0 : i64, scratch_operands = 0 : i64, tpu.core_type = #tpu.core_type<tc>} {
    %c0 = arith.constant 0 : index
    %c0_0 = arith.constant 0 : index
    %0 = vector.load %arg0[%c0, %c0_0] : memref<8x32xf32, #tpu.memory_space<vmem>>, vector<8x32xf32>
    %c0_1 = arith.constant 0 : index
    %c0_2 = arith.constant 0 : index
    %c0_3 = arith.constant 0 : index
    %1 = vector.load %arg1[%c0_1, %c0_2, %c0_3] : memref<3x32x128xbf16, #tpu.memory_space<vmem>>, vector<1x32x128xbf16>
    %2 = vector.shape_cast %1 : vector<1x32x128xbf16> to vector<32x128xbf16>
    %c0_4 = arith.constant 0 : index
    %c0_5 = arith.constant 0 : index
    %c0_6 = arith.constant 0 : index
    %3 = vector.load %arg2[%c0_4, %c0_5, %c0_6] : memref<3x8x128xf32, #tpu.memory_space<vmem>>, vector<1x8x128xf32>
    %4 = vector.shape_cast %3 : vector<1x8x128xf32> to vector<8x128xf32>
    %5 = vector.extract_strided_slice %4 {offsets = [0, 0], sizes = [1, 128], strides = [1, 1]} : vector<8x128xf32> to vector<1x128xf32>
    %6 = vector.extract_strided_slice %4 {offsets = [1, 0], sizes = [1, 128], strides = [1, 1]} : vector<8x128xf32> to vector<1x128xf32>
    %7 = vector.extract_strided_slice %4 {offsets = [2, 0], sizes = [1, 128], strides = [1, 1]} : vector<8x128xf32> to vector<1x128xf32>
    %8 = arith.truncf %0 : vector<8x32xf32> to vector<8x32xbf16>
    %cst = arith.constant dense<0.000000e+00> : vector<8x128xf32>
    %9 = tpu.matmul %8, %2, %cst {dimension_numbers = #tpu.dot_dimension_numbers<[1], [0], [0], [1], [0, 0, 1, 1], [], []>} : vector<8x32xbf16>, vector<32x128xbf16>, vector<8x128xf32> -> vector<8x128xf32>
    %10 = vector.broadcast %5 : vector<1x128xf32> to vector<8x128xf32>
    %11 = arith.addf %9, %10 : vector<8x128xf32>
    %cst_7 = arith.constant dense<0.000000e+00> : vector<128xf32>
    %12 = vector.multi_reduction <add>, %11, %cst_7 [0] : vector<8x128xf32> to vector<128xf32>
    %13 = vector.shape_cast %12 : vector<128xf32> to vector<1x128xf32>
    %cst_8 = arith.constant 1.250000e-01 : f32
    %14 = vector.broadcast %cst_8 : f32 to vector<1x128xf32>
    %15 = arith.mulf %13, %14 : vector<1x128xf32>
    %16 = arith.mulf %11, %11 : vector<8x128xf32>
    %cst_9 = arith.constant dense<0.000000e+00> : vector<128xf32>
    %17 = vector.multi_reduction <add>, %16, %cst_9 [0] : vector<8x128xf32> to vector<128xf32>
    %18 = vector.shape_cast %17 : vector<128xf32> to vector<1x128xf32>
    %cst_10 = arith.constant 1.250000e-01 : f32
    %19 = vector.broadcast %cst_10 : f32 to vector<1x128xf32>
    %20 = arith.mulf %18, %19 : vector<1x128xf32>
    %21 = arith.mulf %15, %15 : vector<1x128xf32>
    %22 = arith.subf %20, %21 : vector<1x128xf32>
    %cst_11 = arith.constant 0.000000e+00 : f32
    %23 = vector.broadcast %cst_11 : f32 to vector<1x128xf32>
    %24 = arith.maximumf %22, %23 : vector<1x128xf32>
    %cst_12 = arith.constant 9.99999974E-6 : f32
    %25 = vector.broadcast %cst_12 : f32 to vector<1x128xf32>
    %26 = arith.addf %24, %25 : vector<1x128xf32>
    %27 = math.rsqrt %26 : vector<1x128xf32>
    %28 = arith.mulf %6, %27 : vector<1x128xf32>
    %29 = arith.mulf %15, %28 : vector<1x128xf32>
    %30 = arith.subf %7, %29 : vector<1x128xf32>
    %31 = vector.broadcast %28 : vector<1x128xf32> to vector<8x128xf32>
    %32 = arith.mulf %11, %31 : vector<8x128xf32>
    %33 = vector.broadcast %30 : vector<1x128xf32> to vector<8x128xf32>
    %34 = arith.addf %32, %33 : vector<8x128xf32>
    %cst_13 = arith.constant 0.000000e+00 : f32
    %35 = vector.broadcast %cst_13 : f32 to vector<8x128xf32>
    %36 = arith.maximumf %34, %35 : vector<8x128xf32>
    %c1 = arith.constant 1 : index
    %c0_14 = arith.constant 0 : index
    %c0_15 = arith.constant 0 : index
    %37 = vector.load %arg1[%c1, %c0_14, %c0_15] : memref<3x32x128xbf16, #tpu.memory_space<vmem>>, vector<1x32x128xbf16>
    %38 = vector.shape_cast %37 : vector<1x32x128xbf16> to vector<32x128xbf16>
    %c1_16 = arith.constant 1 : index
    %c0_17 = arith.constant 0 : index
    %c0_18 = arith.constant 0 : index
    %39 = vector.load %arg2[%c1_16, %c0_17, %c0_18] : memref<3x8x128xf32, #tpu.memory_space<vmem>>, vector<1x8x128xf32>
    %40 = vector.shape_cast %39 : vector<1x8x128xf32> to vector<8x128xf32>
    %41 = vector.extract_strided_slice %40 {offsets = [0, 0], sizes = [1, 128], strides = [1, 1]} : vector<8x128xf32> to vector<1x128xf32>
    %42 = vector.extract_strided_slice %40 {offsets = [1, 0], sizes = [1, 128], strides = [1, 1]} : vector<8x128xf32> to vector<1x128xf32>
    %43 = vector.extract_strided_slice %40 {offsets = [2, 0], sizes = [1, 128], strides = [1, 1]} : vector<8x128xf32> to vector<1x128xf32>
    %44 = vector.extract_strided_slice %36 {offsets = [0, 0], sizes = [8, 32], strides = [1, 1]} : vector<8x128xf32> to vector<8x32xf32>
    %45 = arith.truncf %44 : vector<8x32xf32> to vector<8x32xbf16>
    %cst_19 = arith.constant dense<0.000000e+00> : vector<8x128xf32>
    %46 = tpu.matmul %45, %38, %cst_19 {dimension_numbers = #tpu.dot_dimension_numbers<[1], [0], [0], [1], [0, 0, 1, 1], [], []>} : vector<8x32xbf16>, vector<32x128xbf16>, vector<8x128xf32> -> vector<8x128xf32>
    %47 = vector.broadcast %41 : vector<1x128xf32> to vector<8x128xf32>
    %48 = arith.addf %46, %47 : vector<8x128xf32>
    %cst_20 = arith.constant dense<0.000000e+00> : vector<128xf32>
    %49 = vector.multi_reduction <add>, %48, %cst_20 [0] : vector<8x128xf32> to vector<128xf32>
    %50 = vector.shape_cast %49 : vector<128xf32> to vector<1x128xf32>
    %cst_21 = arith.constant 1.250000e-01 : f32
    %51 = vector.broadcast %cst_21 : f32 to vector<1x128xf32>
    %52 = arith.mulf %50, %51 : vector<1x128xf32>
    %53 = arith.mulf %48, %48 : vector<8x128xf32>
    %cst_22 = arith.constant dense<0.000000e+00> : vector<128xf32>
    %54 = vector.multi_reduction <add>, %53, %cst_22 [0] : vector<8x128xf32> to vector<128xf32>
    %55 = vector.shape_cast %54 : vector<128xf32> to vector<1x128xf32>
    %cst_23 = arith.constant 1.250000e-01 : f32
    %56 = vector.broadcast %cst_23 : f32 to vector<1x128xf32>
    %57 = arith.mulf %55, %56 : vector<1x128xf32>
    %58 = arith.mulf %52, %52 : vector<1x128xf32>
    %59 = arith.subf %57, %58 : vector<1x128xf32>
    %cst_24 = arith.constant 0.000000e+00 : f32
    %60 = vector.broadcast %cst_24 : f32 to vector<1x128xf32>
    %61 = arith.maximumf %59, %60 : vector<1x128xf32>
    %cst_25 = arith.constant 9.99999974E-6 : f32
    %62 = vector.broadcast %cst_25 : f32 to vector<1x128xf32>
    %63 = arith.addf %61, %62 : vector<1x128xf32>
    %64 = math.rsqrt %63 : vector<1x128xf32>
    %65 = arith.mulf %42, %64 : vector<1x128xf32>
    %66 = arith.mulf %52, %65 : vector<1x128xf32>
    %67 = arith.subf %43, %66 : vector<1x128xf32>
    %68 = vector.broadcast %65 : vector<1x128xf32> to vector<8x128xf32>
    %69 = arith.mulf %48, %68 : vector<8x128xf32>
    %70 = vector.broadcast %67 : vector<1x128xf32> to vector<8x128xf32>
    %71 = arith.addf %69, %70 : vector<8x128xf32>
    %cst_26 = arith.constant 0.000000e+00 : f32
    %72 = vector.broadcast %cst_26 : f32 to vector<8x128xf32>
    %73 = arith.maximumf %71, %72 : vector<8x128xf32>
    %c2 = arith.constant 2 : index
    %c0_27 = arith.constant 0 : index
    %c0_28 = arith.constant 0 : index
    %74 = vector.load %arg1[%c2, %c0_27, %c0_28] : memref<3x32x128xbf16, #tpu.memory_space<vmem>>, vector<1x32x128xbf16>
    %75 = vector.shape_cast %74 : vector<1x32x128xbf16> to vector<32x128xbf16>
    %c2_29 = arith.constant 2 : index
    %c0_30 = arith.constant 0 : index
    %c0_31 = arith.constant 0 : index
    %76 = vector.load %arg2[%c2_29, %c0_30, %c0_31] : memref<3x8x128xf32, #tpu.memory_space<vmem>>, vector<1x8x128xf32>
    %77 = vector.shape_cast %76 : vector<1x8x128xf32> to vector<8x128xf32>
    %78 = vector.extract_strided_slice %77 {offsets = [0, 0], sizes = [1, 128], strides = [1, 1]} : vector<8x128xf32> to vector<1x128xf32>
    %79 = vector.extract_strided_slice %77 {offsets = [1, 0], sizes = [1, 128], strides = [1, 1]} : vector<8x128xf32> to vector<1x128xf32>
    %80 = vector.extract_strided_slice %77 {offsets = [2, 0], sizes = [1, 128], strides = [1, 1]} : vector<8x128xf32> to vector<1x128xf32>
    %81 = vector.extract_strided_slice %73 {offsets = [0, 0], sizes = [8, 32], strides = [1, 1]} : vector<8x128xf32> to vector<8x32xf32>
    %82 = arith.truncf %81 : vector<8x32xf32> to vector<8x32xbf16>
    %cst_32 = arith.constant dense<0.000000e+00> : vector<8x128xf32>
    %83 = tpu.matmul %82, %75, %cst_32 {dimension_numbers = #tpu.dot_dimension_numbers<[1], [0], [0], [1], [0, 0, 1, 1], [], []>} : vector<8x32xbf16>, vector<32x128xbf16>, vector<8x128xf32> -> vector<8x128xf32>
    %84 = vector.broadcast %78 : vector<1x128xf32> to vector<8x128xf32>
    %85 = arith.addf %83, %84 : vector<8x128xf32>
    %cst_33 = arith.constant dense<0.000000e+00> : vector<128xf32>
    %86 = vector.multi_reduction <add>, %85, %cst_33 [0] : vector<8x128xf32> to vector<128xf32>
    %87 = vector.shape_cast %86 : vector<128xf32> to vector<1x128xf32>
    %cst_34 = arith.constant 1.250000e-01 : f32
    %88 = vector.broadcast %cst_34 : f32 to vector<1x128xf32>
    %89 = arith.mulf %87, %88 : vector<1x128xf32>
    %90 = arith.mulf %85, %85 : vector<8x128xf32>
    %cst_35 = arith.constant dense<0.000000e+00> : vector<128xf32>
    %91 = vector.multi_reduction <add>, %90, %cst_35 [0] : vector<8x128xf32> to vector<128xf32>
    %92 = vector.shape_cast %91 : vector<128xf32> to vector<1x128xf32>
    %cst_36 = arith.constant 1.250000e-01 : f32
    %93 = vector.broadcast %cst_36 : f32 to vector<1x128xf32>
    %94 = arith.mulf %92, %93 : vector<1x128xf32>
    %95 = arith.mulf %89, %89 : vector<1x128xf32>
    %96 = arith.subf %94, %95 : vector<1x128xf32>
    %cst_37 = arith.constant 0.000000e+00 : f32
    %97 = vector.broadcast %cst_37 : f32 to vector<1x128xf32>
    %98 = arith.maximumf %96, %97 : vector<1x128xf32>
    %cst_38 = arith.constant 9.99999974E-6 : f32
    %99 = vector.broadcast %cst_38 : f32 to vector<1x128xf32>
    %100 = arith.addf %98, %99 : vector<1x128xf32>
    %101 = math.rsqrt %100 : vector<1x128xf32>
    %102 = arith.mulf %79, %101 : vector<1x128xf32>
    %103 = arith.mulf %89, %102 : vector<1x128xf32>
    %104 = arith.subf %80, %103 : vector<1x128xf32>
    %105 = vector.broadcast %102 : vector<1x128xf32> to vector<8x128xf32>
    %106 = arith.mulf %85, %105 : vector<8x128xf32>
    %107 = vector.broadcast %104 : vector<1x128xf32> to vector<8x128xf32>
    %108 = arith.addf %106, %107 : vector<8x128xf32>
    %109 = arith.negf %108 : vector<8x128xf32>
    %110 = math.exp %109 : vector<8x128xf32>
    %cst_39 = arith.constant 1.000000e+00 : f32
    %111 = vector.broadcast %cst_39 : f32 to vector<8x128xf32>
    %112 = arith.addf %111, %110 : vector<8x128xf32>
    %113 = arith.divf %111, %112 : vector<8x128xf32>
    %c0_40 = arith.constant 0 : index
    %c0_41 = arith.constant 0 : index
    %114 = vector.load %arg3[%c0_40, %c0_41] : memref<8x128xf32, #tpu.memory_space<vmem>>, vector<8x128xf32>
    tpu.vector_store %arg3[%c0_40, %c0_41], %113 {strides = array<i32>} : memref<8x128xf32, #tpu.memory_space<vmem>>, vector<8x128xf32>,
    return
  }
}

</mosaic_0001>

<bundles_post_ra>
// kernel: forward.1
= control target key start
LH: loop header
LB: loop body
LE: loop exit
PB: predicated region body
PF: predicated region fallthrough
CT: control target
= control target key end

     0   :  { %8 = vsyncpa [#allocation3], 0  ;;  %s446_s0 = inlined_call_operand.vmem [shape: f32[8,32], index: 0, kind: input, shape index: {}]   ;;  %s447_s1 = inlined_call_operand.hbm [shape: bf16[3,32,128], index: 1, kind: input, shape index: {}]   ;;  %s448_s2 = inlined_call_operand.hbm [shape: f32[3,8,128], index: 2, kind: input, shape index: {}]   ;;  %s449_s3 = inlined_call_operand.vmem [shape: f32[8,128], index: 3, kind: output, shape index: {}]  }
   0x1   :  { %s16_s14 = sshll.u32 %s447_s1, 4  ;;  %s17_s14 = int_to_ptr.hbm [resolvable:$true] %s16_s14 }
   0x2   :  { %9 = vsyncpa [#allocation5], 0  ;;  %s405_s15 = smov [#allocation2]   ;;  %s29_s19 = sshll.u32 %s448_s2, 4  ;;  %s30_s19 = int_to_ptr.hbm [resolvable:$true] %s29_s19 }
   0x3   :  { %s18_s16 = sshll.u32 %s405_s15, 4  ;;  %s406_s20 = smov 64   ;;  %s19_s16 = int_to_ptr.vmem [resolvable:$true] %s18_s16 }
   0x4   :  { %s407_s21 = smov 4   ;;  %s408_s22 = smov [#allocation4]  }
   0x5   :  { %24 = dma.hbm_to_vmem [thread:$0]  %s17_s14, 768, %s19_s16, [#allocation3], %s406_s20, %s406_s20, %s407_s21  }
   0x6   :  { %s31_s23 = sshll.u32 %s408_s22, 4  ;;  %s409_s24 = smov 128   ;;  %s32_s23 = int_to_ptr.vmem [resolvable:$true] %s31_s23 }
   0x7   :  { %s410_s25 = smov 8  }
   0x8   :  { %37 = dma.hbm_to_vmem [thread:$0]  %s30_s19, 384, %s32_s23, [#allocation5], %s409_s24, %s409_s24, %s410_s25  }
   0x9   :  { %401 = dma.done.wait [#allocation3], 768  }
   0xa   :  { %402 = vsyncadd [#allocation3], 4294966528 }
   0xb   :  { %403 = dma.done.wait [#allocation5], 384  }
   0xc   :  { %404 = vsyncadd [#allocation5], 4294966912  ;;  %v332_v0 = vld [vmem:[#allocation2 + $0x8] sm:$0xff]  ;;  %v331_v1 = vld [vmem:[#allocation2] sm:$0xff]  ;;  %vm67_vm0 = vcmask 261120  }
   0xd   :  { %77 = vmatpush.bf16.msra.mxu0 %v332_v0  ;;  %v47_v2 = vld [vmem:[%s446_s0] sm:$0xff]  ;;  %v52_v4 = vld [vmem:[#allocation4] sm:$0xff]  ;;  %v334_v25 = vld [vmem:[#allocation2 + $0x18] sm:$0xff] }
   0xe   :  { %v53_v3 = vpack.c.bf16 %v47_v2, %v47_v2  ;;  %v54_v5 = vperm.slane %v52_v4, 0  ;;  %154 = vmatpush.bf16.msra.mxu1 %v334_v25  ;;  %v333_v27 = vld [vmem:[#allocation2 + $0x10] sm:$0xff]  ;;  %v130_v47 = vld [vmem:[#allocation4 + $0x8] sm:$0xff] }
   0xf   :  { %v132_v48 = vperm.slane %v130_v47, 0 }
  0x11   :  { %78 = vmatpush.bf16.msra.mxu0 %v331_v1 }
  0x12   :  { %155 = vmatpush.bf16.msra.mxu1 %v333_v27 }
  0x14   :  { %311 = vmatmul.msk.bf16.vlgmr.msra.gmra.mxu0 %vm67_vm0, %v53_v3 }
  0x91   :  { %v80_v6 = vpop.f32.mrf.mxu0 }
  0x92   :  { %v81_v7 = vadd.f32 %v80_v6, %v54_v5  ;;  %v335_v6 = vld [vmem:[#allocation2 + $0x20] sm:$0xff] }
  0x94   :  { %v84_v8 = vrot.slane %v81_v7, 4  ;;  %v91_v9 = vmul.f32 %v81_v7, %v81_v7 }
  0x96   :  { %v85_v10 = vadd.f32 %v84_v8, %v81_v7  ;;  %v92_v11 = vrot.slane %v91_v9, 4 }
  0x98   :  { %v86_v12 = vrot.slane %v85_v10, 2  ;;  %v93_v13 = vadd.f32 %v92_v11, %v91_v9 }
  0x99   :  { %v82_v14 = vpop.f32.mrf.mxu0 }
  0x9a   :  { %v87_v15 = vadd.f32 %v86_v12, %v85_v10  ;;  %v94_v16 = vrot.slane %v93_v13, 2 }
  0x9c   :  { %v88_v17 = vrot.slane %v87_v15, 1  ;;  %v95_v18 = vadd.f32 %v94_v16, %v93_v13 }
  0x9e   :  { %v89_v19 = vadd.f32 %v88_v17, %v87_v15  ;;  %v96_v20 = vrot.slane %v95_v18, 1 }
  0xa0   :  { %v90_v21 = vmul.f32 0.125, %v89_v19  ;;  %v97_v22 = vadd.f32 %v96_v20, %v95_v18 }
  0xa2   :  { %v98_v23 = vmul.f32 0.125, %v97_v22  ;;  %v99_v24 = vmul.f32 %v90_v21, %v90_v21 }
  0xa4   :  { %v100_v26 = vsub.f32 %v98_v23, %v99_v24 }
  0xa6   :  { %v101_v28 = vmax.f32 %v100_v26, 0.0  ;;  %v207_v26 = vld [vmem:[#allocation4 + $0x10] sm:$0xff] }
  0xa7   :  { %v209_v27 = vperm.slane %v207_v26, 0 }
  0xa8   :  { %v102_v29 = vadd.f32 1e-05, %v101_v28 }
  0xaa   :  { %343 = vrsqrt.f32 %v102_v29  ;;  %vm109_vm2 = vweird.f32 %v102_v29 }
  0xb0   :  { %v344_v30 = vpop.eup %343 }
  0xb1   :  { %v104_v31 = vmul.f32 %v344_v30, %v102_v29  ;;  %vm110_vm1 = vweird.f32 %v344_v30 }
  0xb2   :  { %vm111_vm3 = vmor %vm109_vm2, %vm110_vm1 }
  0xb3   :  { %v105_v32 = vmul.f32 %v344_v30, %v104_v31 }
  0xb5   :  { %v106_v33 = vmul.f32 0.5, %v105_v32 }
  0xb7   :  { %v107_v34 = vsub.f32 1.5, %v106_v33 }
  0xb9   :  { %v108_v35 = vmul.f32 %v344_v30, %v107_v34 }
  0xbb   :  { %v112_v36 = vsel %vm111_vm3, %v344_v30, %v108_v35 }
  0xbc   :  { %v113_v37 = vmul.f32 %v112_v36, %v52_v4 }
  0xbe   :  { %v114_v38 = vmul.f32 %v113_v37, %v90_v21  ;;  %v119_v40 = vperm.slane %v113_v37, 1 }
  0xc0   :  { %v116_v39 = vrot.slane %v114_v38, 7  ;;  %v120_v42 = vmul.f32 %v119_v40, %v81_v7 }
  0xc2   :  { %v118_v41 = vsub.f32 %v52_v4, %v116_v39  ;;  %v336_v4 = vld [vmem:[#allocation2 + $0x28] sm:$0xff] }
  0xc3   :  { %231 = vmatpush.bf16.msra.mxu2 %v336_v4 }
  0xc4   :  { %v121_v43 = vperm.slane %v118_v41, 2 }
  0xc6   :  { %v122_v44 = vadd.f32 %v121_v43, %v120_v42 }
  0xc7   :  { %232 = vmatpush.bf16.msra.mxu2 %v335_v6 }
  0xc8   :  { %v123_v45 = vmax.f32 %v122_v44, 0.0 }
  0xca   :  { %v131_v46 = vpack.c.bf16 %v123_v45, %v123_v45 }
  0xcc   :  { %320 = vmatmul.msk.bf16.vlgmr.msra.gmra.mxu1 %vm67_vm0, %v131_v46 }
 0x149   :  { %v157_v49 = vpop.f32.mrf.mxu1 }
 0x14a   :  { %v158_v50 = vadd.f32 %v157_v49, %v132_v48 }
 0x14c   :  { %v161_v51 = vrot.slane %v158_v50, 4  ;;  %v168_v52 = vmul.f32 %v158_v50, %v158_v50 }
 0x14e   :  { %v162_v53 = vadd.f32 %v161_v51, %v158_v50  ;;  %v169_v54 = vrot.slane %v168_v52, 4 }
 0x150   :  { %v163_v55 = vrot.slane %v162_v53, 2  ;;  %v170_v56 = vadd.f32 %v169_v54, %v168_v52 }
 0x151   :  { %v159_v57 = vpop.f32.mrf.mxu1 }
 0x152   :  { %v164_v58 = vadd.f32 %v163_v55, %v162_v53  ;;  %v171_v59 = vrot.slane %v170_v56, 2 }
 0x154   :  { %v165_v60 = vrot.slane %v164_v58, 1  ;;  %v172_v61 = vadd.f32 %v171_v59, %v170_v56 }
 0x156   :  { %v166_v62 = vadd.f32 %v165_v60, %v164_v58  ;;  %v173_v63 = vrot.slane %v172_v61, 1 }
 0x158   :  { %v167_v0 = vmul.f32 0.125, %v166_v62  ;;  %v174_v1 = vadd.f32 %v173_v63, %v172_v61 }
 0x15a   :  { %v175_v2 = vmul.f32 0.125, %v174_v1  ;;  %v176_v3 = vmul.f32 %v167_v0, %v167_v0 }
 0x15c   :  { %v177_v5 = vsub.f32 %v175_v2, %v176_v3 }
 0x15e   :  { %v178_v7 = vmax.f32 %v177_v5, 0.0 }
 0x160   :  { %v179_v8 = vadd.f32 1e-05, %v178_v7 }
 0x162   :  { %345 = vrsqrt.f32 %v179_v8  ;;  %vm186_vm5 = vweird.f32 %v179_v8 }
 0x168   :  { %v346_v9 = vpop.eup %345 }
 0x169   :  { %v181_v10 = vmul.f32 %v346_v9, %v179_v8  ;;  %vm187_vm4 = vweird.f32 %v346_v9 }
 0x16a   :  { %vm188_vm6 = vmor %vm186_vm5, %vm187_vm4 }
 0x16b   :  { %v182_v11 = vmul.f32 %v346_v9, %v181_v10 }
 0x16d   :  { %v183_v12 = vmul.f32 0.5, %v182_v11 }
 0x16f   :  { %v184_v13 = vsub.f32 1.5, %v183_v12 }
 0x171   :  { %v185_v14 = vmul.f32 %v346_v9, %v184_v13 }
 0x173   :  { %v189_v15 = vsel %vm188_vm6, %v346_v9, %v185_v14 }
 0x174   :  { %v190_v16 = vmul.f32 %v189_v15, %v130_v47 }
 0x176   :  { %v191_v17 = vmul.f32 %v190_v16, %v167_v0  ;;  %v196_v19 = vperm.slane %v190_v16, 1 }
 0x178   :  { %v193_v18 = vrot.slane %v191_v17, 7  ;;  %v197_v21 = vmul.f32 %v196_v19, %v158_v50 }
 0x17a   :  { %v195_v20 = vsub.f32 %v130_v47, %v193_v18 }
 0x17c   :  { %v198_v22 = vperm.slane %v195_v20, 2 }
 0x17e   :  { %v199_v23 = vadd.f32 %v198_v22, %v197_v21 }
 0x180   :  { %v200_v24 = vmax.f32 %v199_v23, 0.0 }
 0x182   :  { %v208_v25 = vpack.c.bf16 %v200_v24, %v200_v24 }
 0x184   :  { %329 = vmatmul.msk.bf16.vlgmr.msra.gmra.mxu2 %vm67_vm0, %v208_v25 }
 0x207   :  { %v234_v28 = vpop.f32.mrf.mxu2 }
 0x208   :  { %v235_v29 = vadd.f32 %v234_v28, %v209_v27 }
 0x20a   :  { %v238_v30 = vrot.slane %v235_v29, 4  ;;  %v245_v31 = vmul.f32 %v235_v29, %v235_v29 }
 0x20c   :  { %v239_v32 = vadd.f32 %v238_v30, %v235_v29  ;;  %v246_v33 = vrot.slane %v245_v31, 4 }
 0x20e   :  { %v240_v34 = vrot.slane %v239_v32, 2  ;;  %v247_v35 = vadd.f32 %v246_v33, %v245_v31 }
 0x20f   :  { %v236_v36 = vpop.f32.mrf.mxu2 }
 0x210   :  { %v241_v37 = vadd.f32 %v240_v34, %v239_v32  ;;  %v248_v38 = vrot.slane %v247_v35, 2 }
 0x212   :  { %v242_v39 = vrot.slane %v241_v37, 1  ;;  %v249_v40 = vadd.f32 %v248_v38, %v247_v35 }
 0x214   :  { %v243_v41 = vadd.f32 %v242_v39, %v241_v37  ;;  %v250_v42 = vrot.slane %v249_v40, 1 }
 0x216   :  { %v244_v43 = vmul.f32 0.125, %v243_v41  ;;  %v251_v44 = vadd.f32 %v250_v42, %v249_v40 }
 0x218   :  { %v252_v45 = vmul.f32 0.125, %v251_v44  ;;  %v253_v46 = vmul.f32 %v244_v43, %v244_v43 }
 0x21a   :  { %v254_v47 = vsub.f32 %v252_v45, %v253_v46 }
 0x21c   :  { %v255_v48 = vmax.f32 %v254_v47, 0.0 }
 0x21e   :  { %v256_v49 = vadd.f32 1e-05, %v255_v48 }
 0x220   :  { %347 = vrsqrt.f32 %v256_v49  ;;  %vm263_vm8 = vweird.f32 %v256_v49 }
 0x226   :  { %v348_v50 = vpop.eup %347 }
 0x227   :  { %v258_v51 = vmul.f32 %v348_v50, %v256_v49  ;;  %vm264_vm7 = vweird.f32 %v348_v50 }
 0x228   :  { %vm265_vm9 = vmor %vm263_vm8, %vm264_vm7 }
 0x229   :  { %v259_v52 = vmul.f32 %v348_v50, %v258_v51 }
 0x22b   :  { %v260_v53 = vmul.f32 0.5, %v259_v52 }
 0x22d   :  { %v261_v54 = vsub.f32 1.5, %v260_v53 }
 0x22f   :  { %v262_v55 = vmul.f32 %v348_v50, %v261_v54 }
 0x231   :  { %v266_v56 = vsel %vm265_vm9, %v348_v50, %v262_v55 }
 0x232   :  { %v267_v57 = vmul.f32 %v266_v56, %v207_v26 }
 0x234   :  { %v268_v58 = vmul.f32 %v267_v57, %v244_v43  ;;  %v273_v60 = vperm.slane %v267_v57, 1 }
 0x236   :  { %v270_v59 = vrot.slane %v268_v58, 7  ;;  %v274_v62 = vmul.f32 %v273_v60, %v235_v29 }
 0x238   :  { %v272_v61 = vsub.f32 %v207_v26, %v270_v59 }
 0x23a   :  { %v275_v63 = vperm.slane %v272_v61, 2 }
 0x23c   :  { %v276_v0 = vadd.f32 %v275_v63, %v274_v62 }
 0x23e   :  { %v330_v1 = vmul.f32 -1.442695, %v276_v0 }
 0x240   :  { %349 = vpow2.f32 %v330_v1 }
 0x246   :  { %v350_v2 = vpop.eup %349 }
 0x247   :  { %v280_v3 = vadd.f32 1.0, %v350_v2 }
 0x249   :  { %351 = vrcp.f32 %v280_v3  ;;  %v292_v7 = vand.u32 2147483648, %v280_v3  ;;  %v290_v9 = vand.u32 2147483647, %v280_v3  ;;  %vm286_vm11 = vweird.f32 %v280_v3 }
 0x24b   :  { %v293_v11 = vor.u32 1.1754944e-38, %v292_v7  ;;  %vm291_vm13 = vcmp.eq.f32.partialorder %v290_v9, 8.507059e+37 }
 0x24f   :  { %v352_v4 = vpop.eup %351 }
 0x250   :  { %v282_v5 = vmul.f32 %v352_v4, %v280_v3  ;;  %vm287_vm10 = vweird.f32 %v352_v4 }
 0x251   :  { %vm288_vm12 = vmor %vm286_vm11, %vm287_vm10 }
 0x252   :  { %v283_v6 = vsub.f32 1.0, %v282_v5 }
 0x254   :  { %v284_v8 = vmul.f32 %v352_v4, %v283_v6 }
 0x256   :  { %v285_v10 = vadd.f32 %v352_v4, %v284_v8 }
 0x258   :  { %v289_v12 = vsel %vm288_vm12, %v352_v4, %v285_v10 }
 0x259   :  { %v294_v13 = vsel %vm291_vm13, %v293_v11, %v289_v12 }
 0x25a   :  { %296 = vst [vmem:[%s449_s3] sm:$0xff] %v294_v13 }
 0x25b   :  { %301 = vsyncpa [#allocation3], 1 }
 0x25c   :  { %302 = vsyncpa [#allocation5], 1 }

</bundles_post_ra>
